<compile_context>
chip_gen: v7x
topology: tpu7x:2x2x1
jax: 0.10.0
libtpu: 0.0.40
codegen_flags: <defaults>
</compile_context>

<pallas_src>
import jax
import jax.numpy as jnp
from jax.experimental import pallas as pl
from jax.experimental.pallas import tpu as pltpu

_LANE = 128     # TPU lane width: pad all output-feature dims to this.
_TB_MAX = 512   # batch-tile rows per grid step (multiple of 16; VMEM-safe on v7x).


def _round_up(n, m):
    return (n + m - 1) // m * m


def _dqn_kernel(x_ref, w1_ref, b1_ref, w2_ref, b2_ref, w3_ref, b3_ref, o_ref):
    """Fused fc1 -> ReLU -> fc2 -> ReLU -> fc3 on one batch tile.

    MXU operands are bf16; bias add / ReLU / accumulation are f32; the chain stays on
    VMEM values end-to-end (no reshape/transpose of intermediates).
    """
    x = x_ref[...]  # [TB, S] bf16

    h1 = jnp.dot(x, w1_ref[...], preferred_element_type=jnp.float32) + b1_ref[...]
    h1 = jnp.maximum(h1, 0.0)

    h2 = jnp.dot(h1.astype(jnp.bfloat16), w2_ref[...],
                 preferred_element_type=jnp.float32) + b2_ref[...]
    h2 = jnp.maximum(h2, 0.0)

    out = jnp.dot(h2.astype(jnp.bfloat16), w3_ref[...],
                  preferred_element_type=jnp.float32) + b3_ref[...]
    o_ref[...] = out.astype(o_ref.dtype)


def _pad2(a, rows, cols, dtype=None):
    a = jnp.pad(a, ((0, rows - a.shape[0]), (0, cols - a.shape[1])))
    return a.astype(dtype) if dtype is not None else a


@jax.jit
def dqn_forward(x, w1, b1, w2, b2, w3, b3):
    """x: [B, state_size]; wN: [in, out] (transpose of PyTorch [out, in]); bN: [out].

    Returns [B, action_size] float32, matching the PyTorch DQN forward (up to bf16
    rounding of the matmul operands).
    """
    B, S = x.shape
    H = w1.shape[1]
    A = w3.shape[1]

    # Lane-pad output-feature dims to 128 (zero cols/rows are exact no-ops through
    # bias-add/ReLU) and cast matmul operands to bf16. Biases stay f32.
    Hp = _round_up(H, _LANE)
    Ap = _round_up(A, _LANE)
    w1p = _pad2(w1, S, Hp, jnp.bfloat16)
    w2p = _pad2(w2, Hp, Hp, jnp.bfloat16)
    w3p = _pad2(w3, Hp, Ap, jnp.bfloat16)
    b1p = _pad2(b1.reshape(1, -1).astype(jnp.float32), 1, Hp)
    b2p = _pad2(b2.reshape(1, -1).astype(jnp.float32), 1, Hp)
    b3p = _pad2(b3.reshape(1, -1).astype(jnp.float32), 1, Ap)

    # Batch tiling: single block at toy sizes, TB-row tiles (pipelined, megacore-parallel
    # on v7x) at training-batch sizes. All sizes are static under jit.
    tb = _TB_MAX if B >= _TB_MAX else _round_up(B, 16)
    Bp = _round_up(B, tb)
    nb = Bp // tb
    xp = jnp.pad(x, ((0, Bp - B), (0, 0))).astype(jnp.bfloat16)

    flops = 2 * B * (S * H + H * H + H * A)
    bytes_accessed = (xp.size * 2 + Bp * Ap * 4
                      + (w1p.size + w2p.size + w3p.size) * 2
                      + (b1p.size + b2p.size + b3p.size) * 4)

    resident = lambda a: pl.BlockSpec(a.shape, lambda i: (0, 0))  # VMEM-resident across steps

    out = pl.pallas_call(
        _dqn_kernel,
        out_shape=jax.ShapeDtypeStruct((Bp, Ap), jnp.float32),
        grid=(nb,),
        in_specs=[
            pl.BlockSpec((tb, S), lambda i: (i, 0)),   # x: blocked over batch
            resident(w1p), resident(b1p),
            resident(w2p), resident(b2p),
            resident(w3p), resident(b3p),
        ],
        out_specs=pl.BlockSpec((tb, Ap), lambda i: (i, 0)),  # lane-dense (128-wide) output
        compiler_params=pltpu.CompilerParams(dimension_semantics=("parallel",)),
        cost_estimate=pl.CostEstimate(
            flops=flops, transcendentals=0, bytes_accessed=bytes_accessed),
    )(xp, w1p, b1p, w2p, b2p, w3p, b3p)

    return out[:B, :A]


def init_dqn_params(key, state_size, action_size, hidden=64):
    """Deterministic init mimicking PyTorch nn.Linear default (U(-1/sqrt(fan_in), +))."""
    keys = jax.random.split(key, 6)

    def linear(kw, kb, fan_in, fan_out):
        bound = 1.0 / jnp.sqrt(float(fan_in))
        # Stored as [in, out] (transpose of PyTorch's [out, in]); bias as [out].
        w = jax.random.uniform(kw, (fan_in, fan_out), jnp.float32, -bound, bound)
        b = jax.random.uniform(kb, (fan_out,), jnp.float32, -bound, bound)
        return w, b

    w1, b1 = linear(keys[0], keys[1], state_size, hidden)
    w2, b2 = linear(keys[2], keys[3], hidden, hidden)
    w3, b3 = linear(keys[4], keys[5], hidden, action_size)
    return w1, b1, w2, b2, w3, b3


if __name__ == "__main__":
    # Small synthetic shapes consistent with DQN(state_size, action_size).
    batch = 8
    state_size = 16
    action_size = 4

    key = jax.random.PRNGKey(0)
    k_params, k_x = jax.random.split(key)

    params = init_dqn_params(k_params, state_size, action_size)
    x = jax.random.normal(k_x, (batch, state_size), dtype=jnp.float32)

    out = jax.block_until_ready(dqn_forward(x, *params))
    assert out.shape == (batch, action_size)

    w1, b1, w2, b2, w3, b3 = params

    # Reference with the same bf16 cast points as the kernel (tight tolerance).
    def mm(a, w):
        return jnp.dot(a.astype(jnp.bfloat16), w.astype(jnp.bfloat16),
                       preferred_element_type=jnp.float32)
    ref = jnp.maximum(mm(x, w1) + b1, 0.0)
    ref = jnp.maximum(mm(ref, w2) + b2, 0.0)
    ref = mm(ref, w3) + b3
    assert jnp.allclose(out, ref, atol=1e-3, rtol=1e-3), (
        f"max err vs bf16 ref: {float(jnp.max(jnp.abs(out - ref)))}")

    # Full-f32 reference (exact PyTorch math) — loose tolerance for bf16 rounding.
    ref32 = jnp.maximum(x @ w1 + b1, 0.0)
    ref32 = jnp.maximum(ref32 @ w2 + b2, 0.0)
    ref32 = ref32 @ w3 + b3
    assert jnp.allclose(out, ref32, atol=5e-2, rtol=5e-2)

    print("KERNEL_OK")
</pallas_src>

<mosaic_0001>
module attributes {stable_mosaic.version = 11 : i64} {
  func.func @_dqn_kernel(%arg0: i32, %arg1: memref<16x16xbf16, #tpu.memory_space<vmem>>, %arg2: memref<16x128xbf16, #tpu.memory_space<vmem>>, %arg3: memref<1x128xf32, #tpu.memory_space<vmem>>, %arg4: memref<128x128xbf16, #tpu.memory_space<vmem>>, %arg5: memref<1x128xf32, #tpu.memory_space<vmem>>, %arg6: memref<128x128xbf16, #tpu.memory_space<vmem>>, %arg7: memref<1x128xf32, #tpu.memory_space<vmem>>, %arg8: memref<16x128xf32, #tpu.memory_space<vmem>>) attributes {dimension_semantics = [#tpu.dimension_semantics<parallel>], iteration_bounds = array<i64: 1>, scalar_prefetch = 0 : i64, scratch_operands = 0 : i64, tpu.core_type = #tpu.core_type<tc>, window_params = [{transform_indices = @transform_0, window_bounds = array<i64: 16, 16>}, {pipeline_mode = #tpu.pipeline_mode<synchronous>, transform_indices = @transform_1, window_bounds = array<i64: 16, 128>}, {pipeline_mode = #tpu.pipeline_mode<synchronous>, transform_indices = @transform_2, window_bounds = array<i64: 1, 128>}, {pipeline_mode = #tpu.pipeline_mode<synchronous>, transform_indices = @transform_3, window_bounds = array<i64: 128, 128>}, {pipeline_mode = #tpu.pipeline_mode<synchronous>, transform_indices = @transform_4, window_bounds = array<i64: 1, 128>}, {pipeline_mode = #tpu.pipeline_mode<synchronous>, transform_indices = @transform_5, window_bounds = array<i64: 128, 128>}, {pipeline_mode = #tpu.pipeline_mode<synchronous>, transform_indices = @transform_6, window_bounds = array<i64: 1, 128>}, {transform_indices = @transform_7, window_bounds = array<i64: 16, 128>}]} {
    %c0 = arith.constant 0 : index
    %c0_0 = arith.constant 0 : index
    %0 = vector.load %arg1[%c0, %c0_0] : memref<16x16xbf16, #tpu.memory_space<vmem>>, vector<16x16xbf16>
    %c0_1 = arith.constant 0 : index
    %c0_2 = arith.constant 0 : index
    %1 = vector.load %arg2[%c0_1, %c0_2] : memref<16x128xbf16, #tpu.memory_space<vmem>>, vector<16x128xbf16>
    %cst = arith.constant dense<0.000000e+00> : vector<16x128xf32>
    %2 = tpu.matmul %0, %1, %cst {dimension_numbers = #tpu.dot_dimension_numbers<[1], [0], [0], [1], [0, 0, 1, 1], [], []>} : vector<16x16xbf16>, vector<16x128xbf16>, vector<16x128xf32> -> vector<16x128xf32>
    %c0_3 = arith.constant 0 : index
    %c0_4 = arith.constant 0 : index
    %3 = vector.load %arg3[%c0_3, %c0_4] : memref<1x128xf32, #tpu.memory_space<vmem>>, vector<1x128xf32>
    %4 = vector.broadcast %3 : vector<1x128xf32> to vector<16x128xf32>
    %5 = arith.addf %2, %4 : vector<16x128xf32>
    %cst_5 = arith.constant 0.000000e+00 : f32
    %6 = vector.broadcast %cst_5 : f32 to vector<16x128xf32>
    %7 = arith.maximumf %5, %6 : vector<16x128xf32>
    %8 = arith.truncf %7 : vector<16x128xf32> to vector<16x128xbf16>
    %c0_6 = arith.constant 0 : index
    %c0_7 = arith.constant 0 : index
    %9 = vector.load %arg4[%c0_6, %c0_7] : memref<128x128xbf16, #tpu.memory_space<vmem>>, vector<128x128xbf16>
    %cst_8 = arith.constant dense<0.000000e+00> : vector<16x128xf32>
    %10 = tpu.matmul %8, %9, %cst_8 {dimension_numbers = #tpu.dot_dimension_numbers<[1], [0], [0], [1], [0, 0, 1, 1], [], []>} : vector<16x128xbf16>, vector<128x128xbf16>, vector<16x128xf32> -> vector<16x128xf32>
    %c0_9 = arith.constant 0 : index
    %c0_10 = arith.constant 0 : index
    %11 = vector.load %arg5[%c0_9, %c0_10] : memref<1x128xf32, #tpu.memory_space<vmem>>, vector<1x128xf32>
    %12 = vector.broadcast %11 : vector<1x128xf32> to vector<16x128xf32>
    %13 = arith.addf %10, %12 : vector<16x128xf32>
    %cst_11 = arith.constant 0.000000e+00 : f32
    %14 = vector.broadcast %cst_11 : f32 to vector<16x128xf32>
    %15 = arith.maximumf %13, %14 : vector<16x128xf32>
    %16 = arith.truncf %15 : vector<16x128xf32> to vector<16x128xbf16>
    %c0_12 = arith.constant 0 : index
    %c0_13 = arith.constant 0 : index
    %17 = vector.load %arg6[%c0_12, %c0_13] : memref<128x128xbf16, #tpu.memory_space<vmem>>, vector<128x128xbf16>
    %cst_14 = arith.constant dense<0.000000e+00> : vector<16x128xf32>
    %18 = tpu.matmul %16, %17, %cst_14 {dimension_numbers = #tpu.dot_dimension_numbers<[1], [0], [0], [1], [0, 0, 1, 1], [], []>} : vector<16x128xbf16>, vector<128x128xbf16>, vector<16x128xf32> -> vector<16x128xf32>
    %c0_15 = arith.constant 0 : index
    %c0_16 = arith.constant 0 : index
    %19 = vector.load %arg7[%c0_15, %c0_16] : memref<1x128xf32, #tpu.memory_space<vmem>>, vector<1x128xf32>
    %20 = vector.broadcast %19 : vector<1x128xf32> to vector<16x128xf32>
    %21 = arith.addf %18, %20 : vector<16x128xf32>
    %c0_17 = arith.constant 0 : index
    %c0_18 = arith.constant 0 : index
    %22 = vector.load %arg8[%c0_17, %c0_18] : memref<16x128xf32, #tpu.memory_space<vmem>>, vector<16x128xf32>
    tpu.vector_store %arg8[%c0_17, %c0_18], %21 {strides = array<i32>} : memref<16x128xf32, #tpu.memory_space<vmem>>, vector<16x128xf32>,
    return
  }
  func.func @transform_0(%arg0: i32) -> (i32, i32) {
    %c0_i32 = arith.constant 0 : i32
    %c0_i32_0 = arith.constant 0 : i32
    return %arg0, %c0_i32 : i32, i32
  }
  func.func @transform_1(%arg0: i32) -> (i32, i32) {
    %c0_i32 = arith.constant 0 : i32
    %c0_i32_0 = arith.constant 0 : i32
    %c0_i32_1 = arith.constant 0 : i32
    return %c0_i32, %c0_i32_0 : i32, i32
  }
  func.func @transform_2(%arg0: i32) -> (i32, i32) {
    %c0_i32 = arith.constant 0 : i32
    %c0_i32_0 = arith.constant 0 : i32
    %c0_i32_1 = arith.constant 0 : i32
    return %c0_i32, %c0_i32_0 : i32, i32
  }
  func.func @transform_3(%arg0: i32) -> (i32, i32) {
    %c0_i32 = arith.constant 0 : i32
    %c0_i32_0 = arith.constant 0 : i32
    %c0_i32_1 = arith.constant 0 : i32
    return %c0_i32, %c0_i32_0 : i32, i32
  }
  func.func @transform_4(%arg0: i32) -> (i32, i32) {
    %c0_i32 = arith.constant 0 : i32
    %c0_i32_0 = arith.constant 0 : i32
    %c0_i32_1 = arith.constant 0 : i32
    return %c0_i32, %c0_i32_0 : i32, i32
  }
  func.func @transform_5(%arg0: i32) -> (i32, i32) {
    %c0_i32 = arith.constant 0 : i32
    %c0_i32_0 = arith.constant 0 : i32
    %c0_i32_1 = arith.constant 0 : i32
    return %c0_i32, %c0_i32_0 : i32, i32
  }
  func.func @transform_6(%arg0: i32) -> (i32, i32) {
    %c0_i32 = arith.constant 0 : i32
    %c0_i32_0 = arith.constant 0 : i32
    %c0_i32_1 = arith.constant 0 : i32
    return %c0_i32, %c0_i32_0 : i32, i32
  }
  func.func @transform_7(%arg0: i32) -> (i32, i32) {
    %c0_i32 = arith.constant 0 : i32
    %c0_i32_0 = arith.constant 0 : i32
    return %arg0, %c0_i32 : i32, i32
  }
}

</mosaic_0001>

<bundles_post_ra>
// kernel: dqn_forward.1
= control target key start
LH: loop header
LB: loop body
LE: loop exit
PB: predicated region body
PF: predicated region fallthrough
CT: control target
= control target key end

     0   :  { %v438_v0 = vmov 0.0   ;;  %vm439_vm0 = vmmov 0   ;;  %vm49_vm1 = vcmask 130048   ;;  %s569_s1 = inlined_call_operand.vmem [shape: bf16[16,128], index: 1, kind: input, shape index: {}]   ;;  %s570_s0 = inlined_call_operand.vmem [shape: bf16[16,16], index: 0, kind: input, shape index: {}]   ;;  %s571_s3 = inlined_call_operand.vmem [shape: bf16[128,128], index: 3, kind: input, shape index: {}]   ;;  %s572_s5 = inlined_call_operand.vmem [shape: bf16[128,128], index: 5, kind: input, shape index: {}]   ;;  %s573_s2 = inlined_call_operand.vmem [shape: f32[1,128], index: 2, kind: input, shape index: {}]   ;;  %s574_s4 = inlined_call_operand.vmem [shape: f32[1,128], index: 4, kind: input, shape index: {}]   ;;  %s575_s6 = inlined_call_operand.vmem [shape: f32[1,128], index: 6, kind: input, shape index: {}]   ;;  %s576_s7 = inlined_call_operand.vmem [shape: f32[16,128], index: 7, kind: output, shape index: {}]  }
   0x1   :  { %372 = vmatprep.subr.bf16.mxu0 %v438_v0  ;;  %v420_v1 = vld [vmem:[%s569_s1] sm:$0xff]   ;;  %374 = vmatprep.mubr.msk.bf16.mxu0 %vm439_vm0, %v438_v0  ;;  %v423_v4 = vld [vmem:[%s571_s3 + $0x8] sm:$0xff]   ;;  %v424_v5 = vld [vmem:[%s571_s3 + $0x10] sm:$0xff]  }
   0x2   :  { %v421_v2 = vld [vmem:[%s570_s0] sm:$0xff]   ;;  %378 = vmatprep.subr.bf16.mxu1 %v438_v0  ;;  %394 = vmatprep.mubr.msk.bf16.mxu1 %vm439_vm0, %v438_v0  ;;  %v425_v6 = vld [vmem:[%s571_s3 + $0x18] sm:$0xff]   ;;  %v427_v8 = vld [vmem:[%s571_s3 + $0x28] sm:$0xff]  }
   0x3   :  { %373 = vmatpush3.bf16.msra.mxu0 %v420_v1  ;;  %v422_v3 = vld [vmem:[%s571_s3] sm:$0xff]   ;;  %v428_v9 = vld [vmem:[%s571_s3 + $0x30] sm:$0xff]   ;;  %v429_v10 = vld [vmem:[%s571_s3 + $0x38] sm:$0xff]  }
   0x4   :  { %398 = vmatprep.subr.bf16.mxu0 %v438_v0  ;;  %379 = vmatpush3.bf16.msra.mxu1 %v422_v3  ;;  %v426_v7 = vld [vmem:[%s571_s3 + $0x20] sm:$0xff]   ;;  %v431_v12 = vld [vmem:[%s572_s5 + $0x8] sm:$0xff]   ;;  %v432_v13 = vld [vmem:[%s572_s5 + $0x10] sm:$0xff]  }
   0x5   :  { %380 = vmatprep.subr.bf16.mxu1 %v438_v0  ;;  %v430_v11 = vld [vmem:[%s572_s5] sm:$0xff]   ;;  %v433_v14 = vld [vmem:[%s572_s5 + $0x18] sm:$0xff]   ;;  %v435_v16 = vld [vmem:[%s572_s5 + $0x28] sm:$0xff]  }
   0x6   :  { %375 = vmatmul.mubr.msk.bf16.vlgmr.msra.gmra.mrb[0].mxu0 %vm49_vm1, %v421_v2  ;;  %v434_v15 = vld [vmem:[%s572_s5 + $0x20] sm:$0xff]   ;;  %v436_v27 = vld [vmem:[%s572_s5 + $0x30] sm:$0xff]   ;;  %v437_v28 = vld [vmem:[%s572_s5 + $0x38] sm:$0xff]  }
   0x7   :  { %414 = vmatprep.mubr.msk.bf16.mxu0 %vm439_vm0, %v438_v0  ;;  %399 = vmatpush3.bf16.msra.mxu0 %v430_v11  ;;  %v330_v17 = vld [vmem:[%s573_s2] ss:$0 sm:$0xff] }
   0x8   :  { %381 = vmatpush3.bf16.msra.mxu1 %v423_v4  ;;  %400 = vmatprep.subr.bf16.mxu0 %v438_v0  ;;  %v334_v29 = vld [vmem:[%s574_s4] ss:$0 sm:$0xff] }
   0x9   :  { %382 = vmatprep.subr.bf16.mxu1 %v438_v0  ;;  %v343_v39 = vld [vmem:[%s575_s6] ss:$0 sm:$0xff] }
   0xb   :  { %401 = vmatpush3.bf16.msra.mxu0 %v431_v12 }
   0xc   :  { %383 = vmatpush3.bf16.msra.mxu1 %v424_v5  ;;  %402 = vmatprep.subr.bf16.mxu0 %v438_v0 }
   0xd   :  { %384 = vmatprep.subr.bf16.mxu1 %v438_v0 }
   0xf   :  { %403 = vmatpush3.bf16.msra.mxu0 %v432_v13 }
  0x10   :  { %385 = vmatpush3.bf16.msra.mxu1 %v425_v6  ;;  %404 = vmatprep.subr.bf16.mxu0 %v438_v0 }
  0x11   :  { %386 = vmatprep.subr.bf16.mxu1 %v438_v0 }
  0x13   :  { %405 = vmatpush3.bf16.msra.mxu0 %v433_v14 }
  0x14   :  { %387 = vmatpush3.bf16.msra.mxu1 %v426_v7  ;;  %406 = vmatprep.subr.bf16.mxu0 %v438_v0 }
  0x15   :  { %388 = vmatprep.subr.bf16.mxu1 %v438_v0 }
  0x17   :  { %407 = vmatpush3.bf16.msra.mxu0 %v434_v15 }
  0x18   :  { %389 = vmatpush3.bf16.msra.mxu1 %v427_v8  ;;  %408 = vmatprep.subr.bf16.mxu0 %v438_v0 }
  0x19   :  { %390 = vmatprep.subr.bf16.mxu1 %v438_v0 }
  0x1b   :  { %409 = vmatpush3.bf16.msra.mxu0 %v435_v16 }
  0x1c   :  { %391 = vmatpush3.bf16.msra.mxu1 %v428_v9  ;;  %410 = vmatprep.subr.bf16.mxu0 %v438_v0 }
  0x1d   :  { %392 = vmatprep.subr.bf16.mxu1 %v438_v0 }
  0x1f   :  { %411 = vmatpush3.bf16.msra.mxu0 %v436_v27 }
  0x20   :  { %393 = vmatpush3.bf16.msra.mxu1 %v429_v10  ;;  %412 = vmatprep.subr.bf16.mxu0 %v438_v0 }
  0x23   :  { %413 = vmatpush3.bf16.msra.mxu0 %v437_v28 }
  0xd9   :  { %v87_v18 = vpop.f32.mrb[0].mxu0 }
  0xda   :  { %v88_v19 = vadd.f32 %v330_v17, %v87_v18  ;;  %v376_v20 = vpop.f32.mrb[1].mxu0 }
  0xdb   :  { %v90_v21 = vpop.f32.mrb[2].mxu0 }
  0xdc   :  { %v91_v22 = vadd.f32 %v330_v17, %v90_v21  ;;  %v377_v23 = vpop.f32.mrb[3].mxu0  ;;  %v94_v24 = vmax.f32 %v88_v19, 0.0 }
  0xde   :  { %v95_v25 = vmax.f32 %v91_v22, 0.0 }
  0xe0   :  { %v96_v26 = vpack.c.bf16 %v95_v25, %v94_v24 }
  0xe2   :  { %395 = vmatmul.mubr.bf16.vlgmr.msra.gmra.mrb[0].mxu1 %v96_v26 }
 0x1b5   :  { %v202_v30 = vpop.f32.mrb[0].mxu1 }
 0x1b6   :  { %v203_v31 = vadd.f32 %v334_v29, %v202_v30  ;;  %v396_v32 = vpop.f32.mrb[1].mxu1 }
 0x1b7   :  { %v205_v33 = vpop.f32.mrb[2].mxu1 }
 0x1b8   :  { %v206_v34 = vadd.f32 %v334_v29, %v205_v33  ;;  %v397_v35 = vpop.f32.mrb[3].mxu1  ;;  %v209_v36 = vmax.f32 %v203_v31, 0.0 }
 0x1ba   :  { %v210_v37 = vmax.f32 %v206_v34, 0.0 }
 0x1bc   :  { %v211_v38 = vpack.c.bf16 %v210_v37, %v209_v36 }
 0x1be   :  { %415 = vmatmul.mubr.bf16.vlgmr.msra.gmra.mrb[4].mxu0 %v211_v38 }
 0x291   :  { %v317_v40 = vpop.f32.mrb[4].mxu0 }
 0x292   :  { %v318_v41 = vadd.f32 %v343_v39, %v317_v40  ;;  %v416_v42 = vpop.f32.mrb[5].mxu0 }
 0x293   :  { %v320_v43 = vpop.f32.mrb[6].mxu0 }
 0x294   :  { %324 = vst [vmem:[%s576_s7] sm:$0xff] %v318_v41  ;;  %v321_v44 = vadd.f32 %v343_v39, %v320_v43  ;;  %v417_v45 = vpop.f32.mrb[7].mxu0 }
 0x296   :  { %325 = vst [vmem:[%s576_s7 + $0x8] sm:$0xff] %v321_v44 }

</bundles_post_ra>
